<compile_context>
chip_gen: v5e
topology: v5e:2x2
jax: 0.10.0
libtpu: 0.0.40
codegen_flags: <defaults>
</compile_context>

<pallas_src>
import jax
import jax.numpy as jnp
from jax.experimental import pallas as pl
from jax.experimental.pallas import tpu as pltpu


def _round_up(x, m):
    return (x + m - 1) // m * m


# ---------------------------------------------------------------------------
# Kernel
# ---------------------------------------------------------------------------
def _make_ntm_kernel(V, H, T, out_off, head_off, logit_off, head_w):
    """Build the fused NTM kernel for static dims / packing offsets.

    Kernel refs (per batch-tile TB):
      bow_ref   : [TB, V]        f32   bag-of-words counts
      w_ref     : [R, L]         bf16  packed weights:
                    lanes [0:2H)                 = [w_in | w_sc]        (rows :V)
                    lanes [out_off:out_off+H)    = w_out                (rows :H)
                    lanes [head_off:+head_w)     = [w_mu|w_lv|w_mu@w_g|pad|w_mu@w_g@w_d]
      b_ref     : [8, BW]        f32   row0=[b_in|b_sc] row1=b_out
                                       row2=[b_mu|b_lv|b_gen_fold|pad|b_logit_fold]
      slab_ref  : [TB, 4T]       f32   [z_mu | z_logvar | z_gen | z_softmax]
      logit_ref : [TB, V]        f32   x_logit
    """

    def kernel(bow_ref, w_ref, b_ref, slab_ref, logit_ref):
        f32 = jnp.float32
        bf16 = jnp.bfloat16

        # Activations go through the MXU as bf16 (native single-pass matmul);
        # accumulation stays f32 via preferred_element_type.
        x = bow_ref[...].astype(bf16)                                   # [TB, V]

        # ---- encoder: fused [V, 2H] matmul = [w_in | w_sc] -----------------
        w_enc = w_ref[:V, 0:2 * H]                                      # bf16
        b_enc = b_ref[0:1, 0:2 * H]                                     # f32
        both = jnp.dot(x, w_enc, preferred_element_type=f32) + b_enc    # [TB, 2H]
        h = jnp.maximum(both[:, :H], 0.0)                               # relu path
        sc = both[:, H:2 * H]                                           # shortcut

        w_out = w_ref[:H, out_off:out_off + H]
        b_out = b_ref[1:2, 0:H]
        enc = jnp.dot(h.astype(bf16), w_out,
                      preferred_element_type=f32) + b_out + sc
        x_out = jnp.tanh(enc)                                           # [TB, H]

        # ---- folded post-x_out chain: ONE [H, head_w] matmul ---------------
        # columns: [ w_mu | w_lv | w_mu@w_g | pad | w_mu@w_g@w_d ]
        w_head = w_ref[:H, head_off:head_off + head_w]
        b_head = b_ref[2:3, 0:head_w]
        head = jnp.dot(x_out.astype(bf16), w_head,
                       preferred_element_type=f32) + b_head             # [TB, head_w]

        # reparameterize: eval mode -> sample_z = z_mu (already folded in).
        # TODO(synk): training-mode path (mu + eps*exp(0.5*logvar)) would need
        # pltpu.prng_seed/stateful_normal and invalidates the linear fold.
        z_gen = head[:, 2 * T:3 * T]                                    # [TB, T]

        # ---- softmax over topics (exact; off the critical path) ------------
        m = jnp.max(z_gen, axis=-1, keepdims=True)
        e = jnp.exp(z_gen - m)
        z_softmax = e / jnp.sum(e, axis=-1, keepdims=True)

        # ---- outputs --------------------------------------------------------
        # x_logit: tile-aligned 128-lane slice of the folded head result.
        logit_ref[...] = head[:, logit_off:logit_off + V]
        # one lane-dense store: [z_mu | z_logvar | z_gen | z_softmax]
        slab_ref[...] = jnp.concatenate([head[:, 0:3 * T], z_softmax], axis=-1)

    return kernel


# ---------------------------------------------------------------------------
# Host-side packing (one-time)
# ---------------------------------------------------------------------------
def pack_params(p):
    """Fold the post-x_out affine chain and pack everything into one bf16
    weight slab + one f32 bias array (3 kernel inputs total)."""
    f32 = jnp.float32
    V, H = p["w_in"].shape
    T = p["w_mu"].shape[1]

    # eval-mode fold:
    #   z_gen   = x_out @ (w_mu@w_g)    + (b_mu@w_g + b_g)
    #   x_logit = x_out @ (w_mu@w_g@w_d)+ ((b_mu@w_g + b_g)@w_d + b_d)
    w_gen_f = p["w_mu"] @ p["w_g"]                        # [H, T]
    b_gen_f = p["b_mu"] @ p["w_g"] + p["b_g"]             # [1, T]
    w_dec_f = w_gen_f @ p["w_d"]                          # [H, V]
    b_dec_f = b_gen_f @ p["w_d"] + p["b_d"]               # [1, V]

    # 128-lane-aligned segment offsets.
    enc_w = _round_up(2 * H, 128)
    out_w = _round_up(H, 128)
    logit_off = _round_up(3 * T, 128)
    head_w = logit_off + _round_up(V, 128)
    out_off = enc_w
    head_off = enc_w + out_w
    lanes = head_off + head_w
    rows = _round_up(max(V, H), 8)

    w = jnp.zeros((rows, lanes), f32)
    w = w.at[:V, 0:2 * H].set(jnp.concatenate([p["w_in"], p["w_sc"]], axis=1))
    w = w.at[:H, out_off:out_off + H].set(p["w_out"])
    w = w.at[:H, head_off + 0:head_off + T].set(p["w_mu"])
    w = w.at[:H, head_off + T:head_off + 2 * T].set(p["w_lv"])
    w = w.at[:H, head_off + 2 * T:head_off + 3 * T].set(w_gen_f)
    w = w.at[:H, head_off + logit_off:head_off + logit_off + V].set(w_dec_f)
    w_slab = w.astype(jnp.bfloat16)

    b_width = max(enc_w, head_w)
    b = jnp.zeros((8, b_width), f32)
    b = b.at[0, 0:2 * H].set(jnp.concatenate([p["b_in"], p["b_sc"]], axis=1)[0])
    b = b.at[1, 0:H].set(p["b_out"][0])
    b = b.at[2, 0:T].set(p["b_mu"][0])
    b = b.at[2, T:2 * T].set(p["b_lv"][0])
    b = b.at[2, 2 * T:3 * T].set(b_gen_f[0])
    b = b.at[2, logit_off:logit_off + V].set(b_dec_f[0])

    dims = dict(V=V, H=H, T=T, out_off=out_off, head_off=head_off,
                logit_off=logit_off, head_w=head_w)
    return dict(w=w_slab, b=b, dims=dims)


# ---------------------------------------------------------------------------
# Wrapper
# ---------------------------------------------------------------------------
def ntm_forward(bow, packed):
    """Run the fused NTM kernel. `packed` comes from pack_params()."""
    B, V = bow.shape
    d = packed["dims"]
    H, T = d["H"], d["T"]
    assert V == d["V"]

    # Batch tile: the lone grid axis is "parallel" (shards across both v7x
    # TensorCores at large B); degenerates to a single grid step at toy B.
    TB = min(B, 256)
    assert B % TB == 0, "batch must be a multiple of the batch tile"
    nb = B // TB

    kernel = _make_ntm_kernel(V, H, T, d["out_off"], d["head_off"],
                              d["logit_off"], d["head_w"])

    w_shape = packed["w"].shape
    b_shape = packed["b"].shape
    slab_w = 4 * T

    cost = pl.CostEstimate(
        flops=2 * B * (V * 2 * H + H * H + H * d["head_w"]),
        transcendentals=B * (H + T),              # tanh + exp
        bytes_accessed=(B * V * 4                 # bow
                        + w_shape[0] * w_shape[1] * 2
                        + b_shape[0] * b_shape[1] * 4
                        + B * slab_w * 4 + B * V * 4),
    )

    slab, x_logit = pl.pallas_call(
        kernel,
        out_shape=(jax.ShapeDtypeStruct((B, slab_w), jnp.float32),
                   jax.ShapeDtypeStruct((B, V), jnp.float32)),
        grid_spec=pltpu.PrefetchScalarGridSpec(
            num_scalar_prefetch=0,
            grid=(nb,),
            in_specs=[
                pl.BlockSpec((TB, V), lambda i: (i, 0)),      # bow
                pl.BlockSpec(w_shape, lambda i: (0, 0)),      # bf16 weight slab
                pl.BlockSpec(b_shape, lambda i: (0, 0)),      # f32 bias pack
            ],
            out_specs=[
                pl.BlockSpec((TB, slab_w), lambda i: (i, 0)),  # [mu|lv|gen|softmax]
                pl.BlockSpec((TB, V), lambda i: (i, 0)),       # x_logit
            ],
        ),
        compiler_params=pltpu.CompilerParams(
            dimension_semantics=("parallel",),
            vmem_limit_bytes=64 * 1024 * 1024),
        cost_estimate=cost,
    )(bow, packed["w"], packed["b"])

    return dict(
        z_mu=slab[:, 0:T],
        z_logvar=slab[:, T:2 * T],
        z_gen=slab[:, 2 * T:3 * T],
        z_softmax=slab[:, 3 * T:4 * T],
        x_logit=x_logit,
    )


# ---------------------------------------------------------------------------
# Parameters + pure-JAX reference
# ---------------------------------------------------------------------------
def make_params(key, vocab_size, topic_num, hidden_size):
    """Deterministic synthetic parameters, stored [in, out].

    Weights are rounded to bf16-representable values so the kernel's bf16
    weight shipping is lossless for the unfused matrices (the host-side folded
    products are still bf16-quantized; covered by the test tolerances).
    """
    def lin(k, fan_in, fan_out):
        kw, kb = jax.random.split(k)
        scale = 1.0 / jnp.sqrt(jnp.float32(fan_in))
        w = jax.random.uniform(kw, (fan_in, fan_out), jnp.float32, -scale, scale)
        w = w.astype(jnp.bfloat16).astype(jnp.float32)
        b = jax.random.uniform(kb, (1, fan_out), jnp.float32, -scale, scale)
        return w, b

    keys = jax.random.split(key, 8)
    p = {}
    p["w_in"], p["b_in"] = lin(keys[0], vocab_size, hidden_size)     # encoder in fc
    p["w_out"], p["b_out"] = lin(keys[1], hidden_size, hidden_size)  # encoder out fc
    p["w_sc"], p["b_sc"] = lin(keys[2], vocab_size, hidden_size)     # encoder shortcut
    p["w_mu"], p["b_mu"] = lin(keys[3], hidden_size, topic_num)      # q_z_mu
    p["w_lv"], p["b_lv"] = lin(keys[4], hidden_size, topic_num)      # q_z_logvar
    p["w_g"], p["b_g"] = lin(keys[5], topic_num, topic_num)          # generator
    p["w_d"], p["b_d"] = lin(keys[6], topic_num, vocab_size)         # x_decoder
    return p


def ntm_reference(bow, p):
    """Pure-JAX f32 reference of the same forward (eval mode), unfused."""
    h = jnp.maximum(bow @ p["w_in"] + p["b_in"], 0.0)
    enc = h @ p["w_out"] + p["b_out"] + bow @ p["w_sc"] + p["b_sc"]
    x_out = jnp.tanh(enc)
    z_mu = x_out @ p["w_mu"] + p["b_mu"]
    z_logvar = x_out @ p["w_lv"] + p["b_lv"]
    z_gen = z_mu @ p["w_g"] + p["b_g"]
    z_softmax = jax.nn.softmax(z_gen, axis=-1)
    x_logit = z_gen @ p["w_d"] + p["b_d"]
    return dict(z_mu=z_mu, z_logvar=z_logvar, z_softmax=z_softmax,
                x_logit=x_logit, z_gen=z_gen)


if __name__ == "__main__":
    vocab_size, topic_num, hidden_size = 128, 32, 64
    # Batching is the biggest MXU-utilization lever (per review); realistic
    # deployments should feed 128-256 rows per call. Kept modest here.
    batch = 32

    key = jax.random.PRNGKey(0)
    k_x, k_p = jax.random.split(key)

    # bag-of-words counts (non-negative floats)
    bow = jax.random.uniform(k_x, (batch, vocab_size), jnp.float32, 0.0, 3.0)
    params = make_params(k_p, vocab_size, topic_num, hidden_size)
    packed = pack_params(params)

    out = ntm_forward(bow, packed)
    out = jax.tree_util.tree_map(jax.block_until_ready, out)

    ref = ntm_reference(bow, params)
    # bf16 MXU operands + host-side chain folding => no longer bit-identical
    # to the f32 reference; tolerances sized with ample margin vs. the
    # expected quantization error at these magnitudes.
    tols = {"z_mu": 3e-2, "z_logvar": 3e-2, "z_gen": 2e-2,
            "x_logit": 2e-2, "z_softmax": 5e-3}
    for name, tol in tols.items():
        assert out[name].shape == ref[name].shape, name
        assert jnp.allclose(out[name], ref[name], atol=tol, rtol=tol), name

    print("KERNEL_OK")
</pallas_src>

<mosaic_0001>
module attributes {stable_mosaic.version = 11 : i64} {
  func.func @kernel(%arg0: i32, %arg1: memref<32x128xf32, #tpu.memory_space<vmem>>, %arg2: memref<128x512xbf16, #tpu.memory_space<vmem>>, %arg3: memref<8x256xf32, #tpu.memory_space<vmem>>, %arg4: memref<32x128xf32, #tpu.memory_space<vmem>>, %arg5: memref<32x128xf32, #tpu.memory_space<vmem>>) attributes {dimension_semantics = [#tpu.dimension_semantics<parallel>], iteration_bounds = array<i64: 1>, scalar_prefetch = 0 : i64, scratch_operands = 0 : i64, tpu.core_type = #tpu.core_type<tc>, window_params = [{transform_indices = @transform_0, window_bounds = array<i64: 32, 128>}, {pipeline_mode = #tpu.pipeline_mode<synchronous>, transform_indices = @transform_1, window_bounds = array<i64: 128, 512>}, {pipeline_mode = #tpu.pipeline_mode<synchronous>, transform_indices = @transform_2, window_bounds = array<i64: 8, 256>}, {transform_indices = @transform_3, window_bounds = array<i64: 32, 128>}, {transform_indices = @transform_4, window_bounds = array<i64: 32, 128>}]} {
    %c0 = arith.constant 0 : index
    %c0_0 = arith.constant 0 : index
    %0 = vector.load %arg1[%c0, %c0_0] : memref<32x128xf32, #tpu.memory_space<vmem>>, vector<32x128xf32>
    %1 = arith.truncf %0 : vector<32x128xf32> to vector<32x128xbf16>
    %c0_1 = arith.constant 0 : index
    %c0_2 = arith.constant 0 : index
    %2 = vector.load %arg2[%c0_1, %c0_2] : memref<128x512xbf16, #tpu.memory_space<vmem>>, vector<128x128xbf16>
    %c0_3 = arith.constant 0 : index
    %c0_4 = arith.constant 0 : index
    %3 = vector.load %arg3[%c0_3, %c0_4] : memref<8x256xf32, #tpu.memory_space<vmem>>, vector<1x128xf32>
    %cst = arith.constant dense<0.000000e+00> : vector<32x128xf32>
    %4 = tpu.matmul %1, %2, %cst {dimension_numbers = #tpu.dot_dimension_numbers<[1], [0], [0], [1], [0, 0, 1, 1], [], []>} : vector<32x128xbf16>, vector<128x128xbf16>, vector<32x128xf32> -> vector<32x128xf32>
    %5 = vector.broadcast %3 : vector<1x128xf32> to vector<32x128xf32>
    %6 = arith.addf %4, %5 : vector<32x128xf32>
    %7 = vector.extract_strided_slice %6 {offsets = [0, 0], sizes = [32, 64], strides = [1, 1]} : vector<32x128xf32> to vector<32x64xf32>
    %cst_5 = arith.constant 0.000000e+00 : f32
    %8 = vector.broadcast %cst_5 : f32 to vector<32x64xf32>
    %9 = arith.maximumf %7, %8 : vector<32x64xf32>
    %10 = vector.extract_strided_slice %6 {offsets = [0, 64], sizes = [32, 64], strides = [1, 1]} : vector<32x128xf32> to vector<32x64xf32>
    %c0_6 = arith.constant 0 : index
    %c128 = arith.constant 128 : index
    %11 = vector.load %arg2[%c0_6, %c128] : memref<128x512xbf16, #tpu.memory_space<vmem>>, vector<64x64xbf16>
    %c1 = arith.constant 1 : index
    %c0_7 = arith.constant 0 : index
    %12 = vector.load %arg3[%c1, %c0_7] : memref<8x256xf32, #tpu.memory_space<vmem>>, vector<1x64xf32>
    %13 = arith.truncf %9 : vector<32x64xf32> to vector<32x64xbf16>
    %cst_8 = arith.constant dense<0.000000e+00> : vector<32x64xf32>
    %14 = tpu.matmul %13, %11, %cst_8 {dimension_numbers = #tpu.dot_dimension_numbers<[1], [0], [0], [1], [0, 0, 1, 1], [], []>} : vector<32x64xbf16>, vector<64x64xbf16>, vector<32x64xf32> -> vector<32x64xf32>
    %15 = vector.broadcast %12 : vector<1x64xf32> to vector<32x64xf32>
    %16 = arith.addf %14, %15 : vector<32x64xf32>
    %17 = arith.addf %16, %10 : vector<32x64xf32>
    %18 = math.tanh %17 : vector<32x64xf32>
    %c0_9 = arith.constant 0 : index
    %c256 = arith.constant 256 : index
    %19 = vector.load %arg2[%c0_9, %c256] : memref<128x512xbf16, #tpu.memory_space<vmem>>, vector<64x256xbf16>
    %c2 = arith.constant 2 : index
    %c0_10 = arith.constant 0 : index
    %20 = vector.load %arg3[%c2, %c0_10] : memref<8x256xf32, #tpu.memory_space<vmem>>, vector<1x256xf32>
    %21 = arith.truncf %18 : vector<32x64xf32> to vector<32x64xbf16>
    %cst_11 = arith.constant dense<0.000000e+00> : vector<32x256xf32>
    %22 = tpu.matmul %21, %19, %cst_11 {dimension_numbers = #tpu.dot_dimension_numbers<[1], [0], [0], [1], [0, 0, 1, 1], [], []>} : vector<32x64xbf16>, vector<64x256xbf16>, vector<32x256xf32> -> vector<32x256xf32>
    %23 = vector.broadcast %20 : vector<1x256xf32> to vector<32x256xf32>
    %24 = arith.addf %22, %23 : vector<32x256xf32>
    %25 = vector.extract_strided_slice %24 {offsets = [0, 64], sizes = [32, 32], strides = [1, 1]} : vector<32x256xf32> to vector<32x32xf32>
    %cst_12 = arith.constant dense<0xFF800000> : vector<32xf32>
    %26 = vector.multi_reduction <maximumf>, %25, %cst_12 [1] : vector<32x32xf32> to vector<32xf32>
    %27 = vector.shape_cast %26 : vector<32xf32> to vector<32x1xf32>
    %28 = vector.broadcast %27 : vector<32x1xf32> to vector<32x32xf32>
    %29 = arith.subf %25, %28 : vector<32x32xf32>
    %30 = math.exp %29 : vector<32x32xf32>
    %cst_13 = arith.constant dense<0.000000e+00> : vector<32xf32>
    %31 = vector.multi_reduction <add>, %30, %cst_13 [1] : vector<32x32xf32> to vector<32xf32>
    %32 = vector.shape_cast %31 : vector<32xf32> to vector<32x1xf32>
    %33 = vector.broadcast %32 : vector<32x1xf32> to vector<32x32xf32>
    %34 = arith.divf %30, %33 : vector<32x32xf32>
    %35 = vector.extract_strided_slice %24 {offsets = [0, 128], sizes = [32, 128], strides = [1, 1]} : vector<32x256xf32> to vector<32x128xf32>
    %c0_14 = arith.constant 0 : index
    %c0_15 = arith.constant 0 : index
    %36 = vector.load %arg5[%c0_14, %c0_15] : memref<32x128xf32, #tpu.memory_space<vmem>>, vector<32x128xf32>
    tpu.vector_store %arg5[%c0_14, %c0_15], %35 {strides = array<i32>} : memref<32x128xf32, #tpu.memory_space<vmem>>, vector<32x128xf32>,
    %37 = vector.extract_strided_slice %24 {offsets = [0, 0], sizes = [32, 96], strides = [1, 1]} : vector<32x256xf32> to vector<32x96xf32>
    %38 = tpu.concatenate %37, %34 in 1 : vector<32x96xf32>, vector<32x32xf32> -> vector<32x128xf32>
    %c0_16 = arith.constant 0 : index
    %c0_17 = arith.constant 0 : index
    %39 = vector.load %arg4[%c0_16, %c0_17] : memref<32x128xf32, #tpu.memory_space<vmem>>, vector<32x128xf32>
    tpu.vector_store %arg4[%c0_16, %c0_17], %38 {strides = array<i32>} : memref<32x128xf32, #tpu.memory_space<vmem>>, vector<32x128xf32>,
    return
  }
  func.func @transform_0(%arg0: i32) -> (i32, i32) {
    %c0_i32 = arith.constant 0 : i32
    %c0_i32_0 = arith.constant 0 : i32
    return %arg0, %c0_i32 : i32, i32
  }
  func.func @transform_1(%arg0: i32) -> (i32, i32) {
    %c0_i32 = arith.constant 0 : i32
    %c0_i32_0 = arith.constant 0 : i32
    %c0_i32_1 = arith.constant 0 : i32
    return %c0_i32, %c0_i32_0 : i32, i32
  }
  func.func @transform_2(%arg0: i32) -> (i32, i32) {
    %c0_i32 = arith.constant 0 : i32
    %c0_i32_0 = arith.constant 0 : i32
    %c0_i32_1 = arith.constant 0 : i32
    return %c0_i32, %c0_i32_0 : i32, i32
  }
  func.func @transform_3(%arg0: i32) -> (i32, i32) {
    %c0_i32 = arith.constant 0 : i32
    %c0_i32_0 = arith.constant 0 : i32
    return %arg0, %c0_i32 : i32, i32
  }
  func.func @transform_4(%arg0: i32) -> (i32, i32) {
    %c0_i32 = arith.constant 0 : i32
    %c0_i32_0 = arith.constant 0 : i32
    return %arg0, %c0_i32 : i32, i32
  }
}

</mosaic_0001>

<bundles_post_ra>
// kernel: tpu_custom_call.1
= control target key start
LH: loop header
LB: loop body
LE: loop exit
PB: predicated region body
PF: predicated region fallthrough
CT: control target
= control target key end

     0   :  { %10 = vsyncpa [#allocation3], 0  ;;  %s912_s0 = inlined_call_operand.hbm [shape: f32[32,128], index: 0, kind: input, shape index: {}]   ;;  %s913_s1 = inlined_call_operand.hbm [shape: bf16[128,512], index: 1, kind: input, shape index: {}]   ;;  %s914_s2 = inlined_call_operand.hbm [shape: f32[8,256], index: 2, kind: input, shape index: {}]   ;;  %s915_s3 = inlined_call_operand.hbm [shape: f32[32,128], index: 3, kind: output, shape index: {0}]   ;;  %s916_s4 = inlined_call_operand.hbm [shape: f32[32,128], index: 4, kind: output, shape index: {1}]  }
   0x1   :  { %11 = vsyncpa [#allocation6], 0 }
   0x2   :  { %12 = vsyncpa [#allocation4], 0  ;;  %s31_s17 = sshll.u32 %s913_s1, 4  ;;  %s32_s17 = int_to_ptr.hbm [resolvable:$true] %s31_s17 }
   0x3   :  { %13 = vsyncpa [#allocation10], 0  ;;  %s794_s18 = smov [#allocation5]   ;;  %s18_s22 = sshll.u32 %s912_s0, 4  ;;  %s19_s22 = int_to_ptr.hbm [resolvable:$true] %s18_s22 }
   0x4   :  { %s33_s19 = sshll.u32 %s794_s18, 4  ;;  %s795_s23 = smov 256   ;;  %s34_s19 = int_to_ptr.vmem [resolvable:$true] %s33_s19 }
   0x5   :  { %s796_s24 = smov 16   ;;  %s797_s25 = smov [#allocation2]  }
   0x6   :  { %39 = dma.hbm_to_vmem [thread:$0]  %s32_s17, 4096, %s34_s19, [#allocation6], %s795_s23, %s795_s23, %s796_s24  }
   0x7   :  { %s20_s26 = sshll.u32 %s797_s25, 4  ;;  %s798_s27 = smov 128   ;;  %s21_s26 = int_to_ptr.vmem [resolvable:$true] %s20_s26 }
   0x8   :  { %s799_s28 = smov 8   ;;  %s45_s30 = sshll.u32 %s914_s2, 4  ;;  %s46_s30 = int_to_ptr.hbm [resolvable:$true] %s45_s30 }
   0x9   :  { %26 = dma.hbm_to_vmem [thread:$0]  %s19_s22, 512, %s21_s26, [#allocation3], %s798_s27, %s798_s27, %s799_s28  }
   0xa   :  { %s800_s5 = smov [#allocation7]  }
   0xb   :  { %s47_s0 = sshll.u32 %s800_s5, 4  ;;  %s48_s0 = int_to_ptr.vmem [resolvable:$true] %s47_s0 }
   0xc   :  { %50 = dma.hbm_to_vmem [thread:$0]  %s46_s30, 256, %s48_s0, [#allocation6]  }
   0xd   :  { %786 = dma.done.wait [#allocation3], 512  }
   0xe   :  { %787 = vsyncadd [#allocation3], 4294966784 }
   0xf   :  { %788 = dma.done.wait [#allocation6], 4352  }
  0x10   :  { %789 = vsyncadd [#allocation6], 4294962944  ;;  %v555_v0 = vld [vmem:[#allocation5 + $0xe0] sm:$0xf]  ;;  %v618_v1 = vld [vmem:[#allocation5 + $0xec] sm:$0xf0] }
  0x11   :  { %v551_v2 = vld [vmem:[#allocation5 + $0xc0] sm:$0xf]  ;;  %v556_v3 = vor.u32 %v618_v1, %v555_v0  ;;  %v617_v4 = vld [vmem:[#allocation5 + $0xcc] sm:$0xf0]  ;;  %v65_v25 = vld [vmem:[#allocation2 + $0x8] sm:$0xff]  ;;  %s801_s2 = smov 64  }
  0x12   :  { %v552_v5 = vor.u32 %v617_v4, %v551_v2  ;;  %v547_v6 = vld [vmem:[#allocation5 + $0xa0] sm:$0xf]  ;;  %v616_v7 = vld [vmem:[#allocation5 + $0xac] sm:$0xf0]  ;;  %v67_v28 = vld [vmem:[#allocation2 + $0x18] sm:$0xff]  ;;  %vm193_vm0 = vcmask 523264  }
  0x13   :  { %135 = vmatpush.bf16.msra.mxu0 %v556_v3  ;;  %v548_v8 = vor.u32 %v616_v7, %v547_v6  ;;  %v543_v9 = vld [vmem:[#allocation5 + $0x80] sm:$0xf]  ;;  %v615_v10 = vld [vmem:[#allocation5 + $0x8c] sm:$0xf0]  ;;  %v571_v30 = vld [vmem:[#allocation5 + $0x64] sm:$0xf] }
  0x14   :  { %v544_v11 = vor.u32 %v615_v10, %v543_v9  ;;  %v539_v12 = vld [vmem:[#allocation5 + $0x60] sm:$0xf]  ;;  %v614_v13 = vld [vmem:[#allocation5 + $0x6c] sm:$0xf0]  ;;  %v622_v31 = vld [vmem:[#allocation5 + $0x70] sm:$0xf0] }
  0x15   :  { %v540_v14 = vor.u32 %v614_v13, %v539_v12  ;;  %v535_v15 = vld [vmem:[#allocation5 + $0x40] sm:$0xf]  ;;  %v613_v16 = vld [vmem:[#allocation5 + $0x4c] sm:$0xf0]  ;;  %v572_v32 = vor.u32 %v622_v31, %v571_v30  ;;  %v567_v33 = vld [vmem:[#allocation5 + $0x44] sm:$0xf] }
  0x16   :  { %v536_v17 = vor.u32 %v613_v16, %v535_v15  ;;  %v531_v18 = vld [vmem:[#allocation5 + $0x20] sm:$0xf]  ;;  %v612_v19 = vld [vmem:[#allocation5 + $0x2c] sm:$0xf0]  ;;  %v621_v34 = vld [vmem:[#allocation5 + $0x50] sm:$0xf0] }
  0x17   :  { %136 = vmatpush.bf16.msra.mxu0 %v552_v5  ;;  %v532_v20 = vor.u32 %v612_v19, %v531_v18  ;;  %v527_v21 = vld [vmem:[#allocation5] sm:$0xf]  ;;  %v611_v22 = vld [vmem:[#allocation5 + $0xc] sm:$0xf0]  ;;  %204 = vmatpush.bf16.msra.mxu1 %v572_v32  ;;  %v568_v35 = vor.u32 %v621_v34, %v567_v33  ;;  %v563_v36 = vld [vmem:[#allocation5 + $0x24] sm:$0xf] }
  0x18   :  { %v528_v23 = vor.u32 %v611_v22, %v527_v21  ;;  %v64_v24 = vld [vmem:[#allocation2] sm:$0xff]  ;;  %v66_v27 = vld [vmem:[#allocation2 + $0x10] sm:$0xff]  ;;  %v601_v57 = vld [vmem:[#allocation5 + $0x68] sm:$0xf]  ;;  %vm344_vm1 = vcmask 785920   ;;  %vm385_vm2 = vcmask 261120  }
  0x19   :  { %v68_v26 = vpack.c.bf16 %v65_v25, %v64_v24  ;;  %v69_v29 = vpack.c.bf16 %v67_v28, %v66_v27  ;;  %v620_v37 = vld [vmem:[#allocation5 + $0x30] sm:$0xf0]  ;;  %v559_v39 = vld [vmem:[#allocation5 + $0x4] sm:$0xf]  ;;  %v86_v42 = vld [vmem:[#allocation7] ss:$0 sm:$0xff] }
  0x1a   :  { %v564_v38 = vor.u32 %v620_v37, %v563_v36  ;;  %v619_v40 = vld [vmem:[#allocation5 + $0x10] sm:$0xf0]  ;;  %v630_v58 = vld [vmem:[#allocation5 + $0x74] sm:$0xf0]  ;;  %v629_v59 = vld [vmem:[#allocation5 + $0x6c] sm:$0xf] }
  0x1b   :  { %137 = vmatpush.bf16.msra.mxu0 %v548_v8  ;;  %205 = vmatpush.bf16.msra.mxu1 %v568_v35  ;;  %v560_v41 = vor.u32 %v619_v40, %v559_v39  ;;  %v602_v60 = vor.u32 %v630_v58, %v601_v57  ;;  %v603_v61 = vld [vmem:[#allocation5 + $0x78] sm:$0xf0]  ;;  %v593_v63 = vld [vmem:[#allocation5 + $0x48] sm:$0xf]  ;;  %v628_v0 = vld [vmem:[#allocation5 + $0x54] sm:$0xf0] }
  0x1c   :  { %v606_v62 = vor.u32 %v629_v59, %v603_v61  ;;  %v627_v1 = vld [vmem:[#allocation5 + $0x4c] sm:$0xf]  ;;  %v594_v2 = vor.u32 %v628_v0, %v593_v63  ;;  %v595_v3 = vld [vmem:[#allocation5 + $0x58] sm:$0xf0]  ;;  %v585_v5 = vld [vmem:[#allocation5 + $0x28] sm:$0xf] }
  0x1d   :  { %310 = vmatpush.bf16.msra.mxu2 %v602_v60  ;;  %v598_v4 = vor.u32 %v627_v1, %v595_v3  ;;  %v626_v6 = vld [vmem:[#allocation5 + $0x34] sm:$0xf0]  ;;  %v625_v7 = vld [vmem:[#allocation5 + $0x2c] sm:$0xf]  ;;  %v587_v9 = vld [vmem:[#allocation5 + $0x38] sm:$0xf0] }
  0x1e   :  { %329 = vmatpush.bf16.msra.mxu3 %v606_v62  ;;  %v586_v8 = vor.u32 %v626_v6, %v585_v5  ;;  %v590_v10 = vor.u32 %v625_v7, %v587_v9  ;;  %v624_v12 = vld [vmem:[#allocation5 + $0x14] sm:$0xf0]  ;;  %v623_v13 = vld [vmem:[#allocation5 + $0xc] sm:$0xf]  ;;  %v579_v15 = vld [vmem:[#allocation5 + $0x18] sm:$0xf0] }
  0x1f   :  { %138 = vmatpush.bf16.msra.mxu0 %v544_v11  ;;  %206 = vmatpush.bf16.msra.mxu1 %v564_v38  ;;  %v577_v11 = vld [vmem:[#allocation5 + $0x8] sm:$0xf]  ;;  %v582_v16 = vor.u32 %v623_v13, %v579_v15  ;;  %v166_v19 = vld [vmem:[#allocation7 + $0x1] ss:$0 sm:$0xff]  ;;  %s802_s6 = smov 32   ;;  %s803_s7 = smov [#allocation9]  }
  0x20   :  { %v252_v40 = vld [vmem:[#allocation7 + $0x2] ss:$8 sm:$0x3]  ;;  %s504_s8 = sshll.u32 %s803_s7, 4  ;;  %s506_s11 = sshll.u32 %s916_s4, 4  ;;  %s505_s8 = int_to_ptr.vmem [resolvable:$true] %s504_s8  ;;  %s507_s11 = int_to_ptr.hbm [resolvable:$true] %s506_s11 }
  0x21   :  { %311 = vmatpush.bf16.msra.mxu2 %v594_v2  ;;  %s804_s4 = smov [#allocation8]   ;;  %s493_s15 = sshll.u32 %s915_s3, 4  ;;  %s494_s15 = int_to_ptr.hbm [resolvable:$true] %s493_s15 }
  0x22   :  { %330 = vmatpush.bf16.msra.mxu3 %v598_v4  ;;  %s491_s12 = sshll.u32 %s804_s4, 4  ;;  %s492_s12 = int_to_ptr.vmem [resolvable:$true] %s491_s12 }
  0x23   :  { %139 = vmatpush.bf16.msra.mxu0 %v540_v14  ;;  %207 = vmatpush.bf16.msra.mxu1 %v560_v41  ;;  %v578_v14 = vor.u32 %v624_v12, %v577_v11  ;;  %v256_v41 = vperm.slane %v252_v40, 0 }
  0x25   :  { %312 = vmatpush.bf16.msra.mxu2 %v586_v8 }
  0x26   :  { %331 = vmatpush.bf16.msra.mxu3 %v590_v10 }
  0x27   :  { %140 = vmatpush.bf16.msra.mxu0 %v536_v17 }
  0x29   :  { %313 = vmatpush.bf16.msra.mxu2 %v578_v14 }
  0x2a   :  { %332 = vmatpush.bf16.msra.mxu3 %v582_v16 }
  0x2b   :  { %141 = vmatpush.bf16.msra.mxu0 %v532_v20 }
  0x2f   :  { %142 = vmatpush.bf16.msra.mxu0 %v528_v23 }
  0x32   :  { %143 = vmatmul.bf16.vlgmr.msra.gmra.mxu0 %v68_v26 }
  0x42   :  { %148 = vmatmul.bf16.gmra.mxu0 %v69_v29 }
  0xaf   :  { %v144_v43 = vpop.f32.mrf.mxu0 }
  0xb0   :  { %v145_v44 = vadd.f32 %v144_v43, %v86_v42 }
  0xb2   :  { %223 = vrot.lane.b32.xlu0 %v145_v44, %s801_s2  ;;  %v154_v47 = vmax.f32 %v145_v44, 0.0 }
  0xb7   :  { %v146_v45 = vpop.f32.mrf.mxu0 }
  0xb8   :  { %v147_v46 = vadd.f32 %v146_v45, %v86_v42 }
  0xba   :  { %v155_v48 = vmax.f32 %v147_v46, 0.0  ;;  %225 = vrot.lane.b32.xlu0 %v147_v46, %s801_s2 }
  0xbc   :  { %v167_v49 = vpack.c.bf16 %v155_v48, %v154_v47 }
  0xbe   :  { %573 = vmatmul.msk.bf16.vlgmr.msra.gmra.mxu1 %vm193_vm0, %v167_v49 }
  0xbf   :  { %v149_v50 = vpop.f32.mrf.mxu0 }
  0xc0   :  { %v150_v51 = vadd.f32 %v149_v50, %v86_v42 }
  0xc2   :  { %227 = vrot.lane.b32.xlu1 %v150_v51, %s801_s2  ;;  %v156_v54 = vmax.f32 %v150_v51, 0.0 }
  0xc7   :  { %v151_v52 = vpop.f32.mrf.mxu0 }
  0xc8   :  { %v152_v53 = vadd.f32 %v151_v52, %v86_v42  ;;  %v257_v42 = vperm.slane %v252_v40, 1 }
  0xca   :  { %v157_v55 = vmax.f32 %v152_v53, 0.0  ;;  %229 = vrot.lane.b32.xlu1 %v152_v53, %s801_s2 }
  0xcc   :  { %v168_v56 = vpack.c.bf16 %v157_v55, %v156_v54 }
  0xce   :  { %574 = vmatmul.msk.bf16.gmra.mxu1 %vm193_vm0, %v168_v56 }
 0x124   :  { %v224_v17 = vpop.permute.xlu0 %223 }
 0x12c   :  { %v226_v24 = vpop.permute.xlu0 %225 }
 0x134   :  { %v228_v26 = vpop.permute.xlu1 %227 }
 0x13b   :  { %v209_v18 = vpop.f32.mrf.mxu1 }
 0x13c   :  { %v210_v20 = vadd.f32 %v209_v18, %v166_v19  ;;  %v230_v35 = vpop.permute.xlu1 %229 }
 0x13e   :  { %v235_v21 = vadd.f32 %v224_v17, %v210_v20 }
 0x140   :  { %642 = vtanh.f32 %v235_v21 }
 0x143   :  { %v211_v22 = vpop.f32.mrf.mxu1 }
 0x144   :  { %v212_v23 = vadd.f32 %v211_v22, %v166_v19 }
 0x146   :  { %v236_v25 = vadd.f32 %v226_v24, %v212_v23  ;;  %v643_v28 = vpop.eup %642 }
 0x148   :  { %644 = vtanh.f32 %v236_v25 }
 0x14b   :  { %v214_v27 = vpop.f32.mrf.mxu1 }
 0x14c   :  { %v215_v30 = vadd.f32 %v214_v27, %v166_v19 }
 0x14e   :  { %v645_v29 = vpop.eup %644  ;;  %v237_v32 = vadd.f32 %v228_v26, %v215_v30 }
 0x14f   :  { %v253_v31 = vpack.c.bf16 %v645_v29, %v643_v28 }
 0x150   :  { %646 = vtanh.f32 %v237_v32 }
 0x151   :  { %607 = vmatmul.msk.bf16.vlgmr.msra.gmra.mxu2 %vm193_vm0, %v253_v31  ;;  %609 = vmatmul.msk.bf16.vlgmr.msra.gmra.mxu3 %vm193_vm0, %v253_v31 }
 0x153   :  { %v216_v33 = vpop.f32.mrf.mxu1 }
 0x154   :  { %v217_v34 = vadd.f32 %v216_v33, %v166_v19 }
 0x156   :  { %v238_v36 = vadd.f32 %v230_v35, %v217_v34  ;;  %v647_v37 = vpop.eup %646 }
 0x158   :  { %648 = vtanh.f32 %v238_v36 }
 0x15e   :  { %v649_v38 = vpop.eup %648 }
 0x15f   :  { %v254_v39 = vpack.c.bf16 %v649_v38, %v647_v37 }
 0x161   :  { %608 = vmatmul.msk.bf16.gmra.mxu2 %vm193_vm0, %v254_v39  ;;  %610 = vmatmul.msk.bf16.gmra.mxu3 %vm193_vm0, %v254_v39 }
 0x1d4   :  { %v315_v43 = vpop.f32.mrf.mxu2  ;;  %v334_v44 = vpop.f32.mrf.mxu3 }
 0x1d5   :  { %v852_v45 = vadd.f32 %v315_v43, %v256_v41  ;;  %v335_v46 = vadd.f32 %v334_v44, %v257_v42 }
 0x1d7   :  { %458 = vst [vmem:[#allocation9] sm:$0xff] %v335_v46  ;;  %v345_v47 = vsel %vm344_vm1, %v852_v45, -inf }
 0x1d8   :  { %346 = vmax.xlane.f32.xlu2 %v345_v47 }
 0x1dc   :  { %v317_v48 = vpop.f32.mrf.mxu2  ;;  %v336_v49 = vpop.f32.mrf.mxu3 }
 0x1dd   :  { %v856_v50 = vadd.f32 %v317_v48, %v256_v41  ;;  %v337_v51 = vadd.f32 %v336_v49, %v257_v42 }
 0x1df   :  { %459 = vst [vmem:[#allocation9 + $0x8] sm:$0xff] %v337_v51  ;;  %v348_v52 = vsel %vm344_vm1, %v856_v50, -inf }
 0x1e0   :  { %349 = vmax.xlane.f32.xlu2 %v348_v52 }
 0x1e4   :  { %v320_v53 = vpop.f32.mrf.mxu2  ;;  %v339_v54 = vpop.f32.mrf.mxu3 }
 0x1e5   :  { %v860_v55 = vadd.f32 %v320_v53, %v256_v41  ;;  %v340_v56 = vadd.f32 %v339_v54, %v257_v42 }
 0x1e7   :  { %460 = vst [vmem:[#allocation9 + $0x10] sm:$0xff] %v340_v56  ;;  %v351_v57 = vsel %vm344_vm1, %v860_v55, -inf }
 0x1e8   :  { %352 = vmax.xlane.f32.xlu0 %v351_v57 }
 0x1ec   :  { %v322_v58 = vpop.f32.mrf.mxu2  ;;  %v341_v59 = vpop.f32.mrf.mxu3 }
 0x1ed   :  { %v864_v60 = vadd.f32 %v322_v58, %v256_v41  ;;  %v342_v61 = vadd.f32 %v341_v59, %v257_v42 }
 0x1ef   :  { %461 = vst [vmem:[#allocation9 + $0x18] sm:$0xff] %v342_v61  ;;  %v354_v62 = vsel %vm344_vm1, %v864_v60, -inf }
 0x1f0   :  { %355 = vmax.xlane.f32.xlu1 %v354_v62  ;;  %512 = dma.vmem_to_hbm [thread:$0]  %s505_s8, 512, %s507_s11, [#allocation10], %s798_s27, %s798_s27, %s799_s28  }
 0x24b   :  { %v347_v63 = vpop.xlane.xlu2 %346 }
 0x24c   :  { %v357_v0 = vsub.f32 %v852_v45, %v347_v63 }
 0x24e   :  { %v361_v1 = vmul.f32 1.442695, %v357_v0 }
 0x250   :  { %650 = vpow2.f32 %v361_v1 }
 0x253   :  { %v350_v2 = vpop.xlane.xlu2 %349 }
 0x254   :  { %v358_v3 = vsub.f32 %v856_v50, %v350_v2 }
 0x256   :  { %v651_v4 = vpop.eup %650  ;;  %v363_v5 = vmul.f32 1.442695, %v358_v3 }
 0x257   :  { %373 = vrot.lane.b32.xlu2 %v651_v4, %s801_s2 }
 0x258   :  { %652 = vpow2.f32 %v363_v5 }
 0x25b   :  { %v353_v6 = vpop.xlane.xlu0 %352 }
 0x25c   :  { %v359_v7 = vsub.f32 %v860_v55, %v353_v6 }
 0x25e   :  { %v872_v8 = vpop.eup %652  ;;  %v365_v9 = vmul.f32 1.442695, %v359_v7 }
 0x25f   :  { %375 = vrot.lane.b32.xlu2 %v872_v8, %s801_s2 }
 0x260   :  { %654 = vpow2.f32 %v365_v9 }
 0x263   :  { %v356_v10 = vpop.xlane.xlu1 %355 }
 0x264   :  { %v360_v11 = vsub.f32 %v864_v60, %v356_v10 }
 0x266   :  { %v877_v12 = vpop.eup %654  ;;  %v367_v13 = vmul.f32 1.442695, %v360_v11 }
 0x267   :  { %377 = vrot.lane.b32.xlu2 %v877_v12, %s801_s2 }
 0x268   :  { %656 = vpow2.f32 %v367_v13 }
 0x26e   :  { %v881_v14 = vpop.eup %656 }
 0x26f   :  { %379 = vrot.lane.b32.xlu2 %v881_v14, %s801_s2 }
 0x2b1   :  { %v374_v15 = vpop.permute.xlu2 %373 }
 0x2b2   :  { %v386_v16 = vsel %vm385_vm2, %v374_v15, 0.0 }
 0x2b3   :  { %387 = vadd.xlane.f32.xlu0 %v386_v16 }
 0x2b9   :  { %v376_v17 = vpop.permute.xlu2 %375 }
 0x2ba   :  { %v389_v18 = vsel %vm385_vm2, %v376_v17, 0.0 }
 0x2bb   :  { %390 = vadd.xlane.f32.xlu1 %v389_v18 }
 0x2c1   :  { %v378_v19 = vpop.permute.xlu2 %377 }
 0x2c2   :  { %v392_v20 = vsel %vm385_vm2, %v378_v19, 0.0 }
 0x2c3   :  { %393 = vadd.xlane.f32.xlu2 %v392_v20 }
 0x2c9   :  { %v380_v21 = vpop.permute.xlu2 %379 }
 0x2ca   :  { %v395_v22 = vsel %vm385_vm2, %v380_v21, 0.0 }
 0x2cb   :  { %396 = vadd.xlane.f32.xlu0 %v395_v22 }
 0x326   :  { %v388_v23 = vpop.xlane.xlu0 %387 }
 0x327   :  { %658 = vrcp.f32 %v388_v23  ;;  %v409_v29 = vand.u32 2147483648, %v388_v23  ;;  %v407_v30 = vand.u32 2147483647, %v388_v23  ;;  %vm403_vm4 = vweird.f32 %v388_v23 }
 0x329   :  { %v410_v33 = vor.u32 1.1754944e-38, %v409_v29  ;;  %vm408_vm6 = vcmp.eq.f32.partialorder %v407_v30, 8.507059e+37 }
 0x32d   :  { %v659_v24 = vpop.eup %658 }
 0x32e   :  { %v399_v25 = vmul.f32 %v659_v24, %v388_v23  ;;  %v391_v26 = vpop.xlane.xlu1 %390  ;;  %vm404_vm3 = vweird.f32 %v659_v24 }
 0x32f   :  { %660 = vrcp.f32 %v391_v26  ;;  %vm405_vm5 = vmor %vm403_vm4, %vm404_vm3  ;;  %v424_v39 = vand.u32 2147483648, %v391_v26  ;;  %v422_v42 = vand.u32 2147483647, %v391_v26  ;;  %vm418_vm8 = vweird.f32 %v391_v26 }
 0x330   :  { %v400_v27 = vsub.f32 1.0, %v399_v25  ;;  %vm478_vm3 = vcmask 785408  }
 0x331   :  { %v425_v46 = vor.u32 1.1754944e-38, %v424_v39  ;;  %vm423_vm10 = vcmp.eq.f32.partialorder %v422_v42, 8.507059e+37 }
 0x332   :  { %v401_v28 = vmul.f32 %v659_v24, %v400_v27 }
 0x334   :  { %v402_v31 = vadd.f32 %v659_v24, %v401_v28 }
 0x335   :  { %v661_v32 = vpop.eup %660 }
 0x336   :  { %v414_v34 = vmul.f32 %v661_v32, %v391_v26  ;;  %v394_v35 = vpop.xlane.xlu2 %393  ;;  %v406_v36 = vsel %vm405_vm5, %v659_v24, %v402_v31  ;;  %vm419_vm7 = vweird.f32 %v661_v32 }
 0x337   :  { %662 = vrcp.f32 %v394_v35  ;;  %v411_v38 = vsel %vm408_vm6, %v410_v33, %v406_v36  ;;  %vm420_vm9 = vmor %vm418_vm8, %vm419_vm7  ;;  %v439_v54 = vand.u32 2147483648, %v394_v35  ;;  %v437_v57 = vand.u32 2147483647, %v394_v35 }
 0x338   :  { %v415_v37 = vsub.f32 1.0, %v414_v34  ;;  %v412_v40 = vmul.f32 %v651_v4, %v411_v38  ;;  %vm433_vm12 = vweird.f32 %v394_v35 }
 0x339   :  { %v440_v61 = vor.u32 1.1754944e-38, %v439_v54  ;;  %vm438_vm14 = vcmp.eq.f32.partialorder %v437_v57, 8.507059e+37 }
 0x33a   :  { %v416_v41 = vmul.f32 %v661_v32, %v415_v37  ;;  %466 = vrot.lane.b32.xlu1 %v412_v40, %s802_s6 }
 0x33c   :  { %v417_v43 = vadd.f32 %v661_v32, %v416_v41 }
 0x33d   :  { %v663_v44 = vpop.eup %662 }
 0x33e   :  { %v429_v47 = vmul.f32 %v663_v44, %v394_v35  ;;  %v397_v48 = vpop.xlane.xlu0 %396  ;;  %v421_v49 = vsel %vm420_vm9, %v661_v32, %v417_v43  ;;  %vm434_vm11 = vweird.f32 %v663_v44 }
 0x33f   :  { %664 = vrcp.f32 %v397_v48  ;;  %v426_v51 = vsel %vm423_vm10, %v425_v46, %v421_v49  ;;  %vm435_vm13 = vmor %vm433_vm12, %vm434_vm11  ;;  %v454_v3 = vand.u32 2147483648, %v397_v48  ;;  %v452_v5 = vand.u32 2147483647, %v397_v48 }
 0x340   :  { %v430_v52 = vsub.f32 1.0, %v429_v47  ;;  %v427_v53 = vmul.f32 %v872_v8, %v426_v51  ;;  %vm448_vm0 = vweird.f32 %v397_v48 }
 0x341   :  { %v455_v7 = vor.u32 1.1754944e-38, %v454_v3  ;;  %vm453_vm2 = vcmp.eq.f32.partialorder %v452_v5, 8.507059e+37 }
 0x342   :  { %v431_v56 = vmul.f32 %v663_v44, %v430_v52  ;;  %468 = vrot.lane.b32.xlu0 %v427_v53, %s802_s6 }
 0x344   :  { %v432_v58 = vadd.f32 %v663_v44, %v431_v56 }
 0x345   :  { %v665_v59 = vpop.eup %664 }
 0x346   :  { %v444_v62 = vmul.f32 %v665_v59, %v397_v48  ;;  %v436_v63 = vsel %vm435_vm13, %v663_v44, %v432_v58  ;;  %vm449_vm15 = vweird.f32 %v665_v59 }
 0x347   :  { %v441_v0 = vsel %vm438_vm14, %v440_v61, %v436_v63  ;;  %vm450_vm1 = vmor %vm448_vm0, %vm449_vm15 }
 0x348   :  { %v445_v1 = vsub.f32 1.0, %v444_v62  ;;  %v442_v2 = vmul.f32 %v877_v12, %v441_v0 }
 0x34a   :  { %v446_v4 = vmul.f32 %v665_v59, %v445_v1  ;;  %470 = vrot.lane.b32.xlu1 %v442_v2, %s802_s6 }
 0x34c   :  { %v447_v6 = vadd.f32 %v665_v59, %v446_v4 }
 0x34e   :  { %v451_v8 = vsel %vm450_vm1, %v665_v59, %v447_v6 }
 0x34f   :  { %v456_v9 = vsel %vm453_vm2, %v455_v7, %v451_v8 }
 0x350   :  { %v457_v10 = vmul.f32 %v881_v14, %v456_v9 }
 0x352   :  { %472 = vrot.lane.b32.xlu0 %v457_v10, %s802_s6 }
 0x3ac   :  { %v467_v11 = vpop.permute.xlu1 %466 }
 0x3ad   :  { %v479_v12 = vsel %vm478_vm3, %v852_v45, %v467_v11 }
 0x3ae   :  { %483 = vst [vmem:[#allocation8] sm:$0xff] %v479_v12 }
 0x3b4   :  { %v469_v13 = vpop.permute.xlu0 %468 }
 0x3b5   :  { %v480_v15 = vsel %vm478_vm3, %v856_v50, %v469_v13 }
 0x3b6   :  { %484 = vst [vmem:[#allocation8 + $0x8] sm:$0xff] %v480_v15 }
 0x3bc   :  { %v471_v16 = vpop.permute.xlu1 %470 }
 0x3bd   :  { %v481_v17 = vsel %vm478_vm3, %v860_v55, %v471_v16 }
 0x3be   :  { %485 = vst [vmem:[#allocation8 + $0x10] sm:$0xff] %v481_v17 }
 0x3c4   :  { %v473_v14 = vpop.permute.xlu0 %472 }
 0x3c5   :  { %v482_v45 = vsel %vm478_vm3, %v864_v60, %v473_v14 }
 0x3c6   :  { %486 = vst [vmem:[#allocation8 + $0x18] sm:$0xff] %v482_v45 }
 0x3c7   :  { %499 = dma.vmem_to_hbm [thread:$0]  %s492_s12, 512, %s494_s15, [#allocation4], %s798_s27, %s798_s27, %s799_s28  }
 0x3c8   :  { %790 = dma.done.wait [#allocation4], 512  }
 0x3c9   :  { %791 = vsyncadd [#allocation4], 4294966784 }
 0x3ca   :  { %792 = dma.done.wait [#allocation10], 512  }
 0x3cb   :  { %793 = vsyncadd [#allocation10], 4294966784 }
 0x3cc   :  { %521 = vsyncpa [#allocation3], 1 }
 0x3cd   :  { %522 = vsyncpa [#allocation6], 1 }
 0x3ce   :  { %523 = vsyncpa [#allocation4], 1 }
 0x3cf   :  { %524 = vsyncpa [#allocation10], 1 }

</bundles_post_ra>
